<compile_context>
chip_gen: v6e
topology: v6e:2x2x1
jax: 0.10.0
libtpu: 0.0.40
codegen_flags: <defaults>
</compile_context>

<pallas_src>
import math

import numpy as np
import jax
import jax.numpy as jnp
from jax.experimental import pallas as pl
from jax.experimental.pallas import tpu as pltpu

# Model hyper-parameters (small, consistent with the module's __init__).
HID_DIM = 32
N_HEADS = 4
HEAD_DIM = HID_DIM // N_HEADS
PF_DIM = 64
SEQ = 8
BATCH = 2
TOKENS = BATCH * SEQ
LN_EPS = 1e-5  # torch.nn.LayerNorm default

# Row layout of the packed (24, 128) vector slab (single DMA, single tile).
_ROW_BQKV, _ROW_BO, _ROW_B1, _ROW_B2, _ROW_G, _ROW_B, _ROW_MASK = range(7)
_ROW_BLOCK = 8                       # rows 8 .. 8+TOKENS-1: block-diag bias
VEC_ROWS = _ROW_BLOCK + TOKENS       # 24


def _layernorm(y, g, b):
    # Single pass: mean and E[y^2] together, var = E[y^2] - mu^2.
    mu = jnp.mean(y, axis=-1, keepdims=True)
    ms = jnp.mean(y * y, axis=-1, keepdims=True)
    inv = jax.lax.rsqrt(ms - mu * mu + LN_EPS)
    return (y - mu) * (inv * g) + b


def encoder_layer_kernel(src_ref, wqkv_ref, wo_ref, w1_ref, w2_ref, vec_ref,
                         out_ref, hv_ref):
    T = TOKENS
    x = src_ref[...]                                    # (T, H) f32
    inv_sqrt2 = jnp.float32(1.0 / math.sqrt(2.0))

    # Packed bias / LayerNorm / mask / block-diag slab (static slices, free).
    bqkv = vec_ref[_ROW_BQKV:_ROW_BQKV + 1, 0:3 * HID_DIM]   # (1, 3H)
    bo = vec_ref[_ROW_BO:_ROW_BO + 1, 0:HID_DIM]             # (1, H)
    b1 = vec_ref[_ROW_B1:_ROW_B1 + 1, 0:PF_DIM]              # (1, PF)
    b2 = vec_ref[_ROW_B2:_ROW_B2 + 1, 0:HID_DIM]             # (1, H)
    g = vec_ref[_ROW_G:_ROW_G + 1, 0:HID_DIM]                # (1, H)
    b = vec_ref[_ROW_B:_ROW_B + 1, 0:HID_DIM]                # (1, H)
    mask_row = vec_ref[_ROW_MASK:_ROW_MASK + 1, 0:T]         # (1, T)
    block_neg = vec_ref[_ROW_BLOCK:_ROW_BLOCK + T, 0:T]      # (T, T) constant

    # Fused Q|K|V projection: bf16 operands, f32 accumulate.  1/sqrt(head_dim)
    # is already folded into the Q columns of wqkv / bqkv.
    qkv = jnp.dot(x.astype(jnp.bfloat16), wqkv_ref[...],
                  preferred_element_type=jnp.float32) + bqkv        # (T, 3H)

    # Additive attention bias: runtime key-mask select + constant block-diag.
    neg_bias = jnp.where(mask_row != 0.0, 0.0, jnp.float32(-1e10)) + block_neg

    dn = (((1,), (1,)), ((), ()))   # contract last dims: (T,hd) x (T,hd) -> (T,T)
    for h in range(N_HEADS):        # static unrolled loop over heads
        lo = h * HEAD_DIM
        qh = qkv[:, lo:lo + HEAD_DIM].astype(jnp.bfloat16)
        kh = qkv[:, HID_DIM + lo:HID_DIM + lo + HEAD_DIM].astype(jnp.bfloat16)
        vh = qkv[:, 2 * HID_DIM + lo:2 * HID_DIM + lo + HEAD_DIM].astype(jnp.bfloat16)

        energy = jax.lax.dot_general(qh, kh, dn,
                                     preferred_element_type=jnp.float32)
        energy = energy + neg_bias
        emax = jnp.max(energy, axis=-1, keepdims=True)
        p = jnp.exp(energy - emax)
        denom = jnp.sum(p, axis=-1, keepdims=True)
        attn = p * pl.reciprocal(denom, approx=True)    # EUP slot, no VALU divide

        # Stash per-head output at a static lane offset -> one wide wo matmul.
        hv_ref[:, lo:lo + HEAD_DIM] = jnp.dot(attn.astype(jnp.bfloat16), vh,
                                              preferred_element_type=jnp.float32)

    ao = jnp.dot(hv_ref[...].astype(jnp.bfloat16), wo_ref[...],
                 preferred_element_type=jnp.float32) + bo            # (T, H)

    x1 = _layernorm(x + ao, g, b)   # residual + LN (module shares one LayerNorm)

    # Positionwise feed-forward with exact erf GELU (matches torch.erf spec).
    h1 = jnp.dot(x1.astype(jnp.bfloat16), w1_ref[...],
                 preferred_element_type=jnp.float32) + b1
    h1 = h1 * 0.5 * (1.0 + jax.lax.erf(h1 * inv_sqrt2))
    h2 = jnp.dot(h1.astype(jnp.bfloat16), w2_ref[...],
                 preferred_element_type=jnp.float32) + b2

    out_ref[...] = _layernorm(x1 + h2, g, b)            # residual + LN (same params)


def _full_spec(shape):
    zeros = (0,) * len(shape)
    return pl.BlockSpec(shape, lambda i, _z=zeros: _z)


def _pad128(v):
    return jnp.pad(v, ((0, 0), (0, 128 - v.shape[1])))


def encoder_layer(src, mask, params):
    B, S, H = src.shape
    T = B * S
    inv_scale = 1.0 / math.sqrt(HEAD_DIM)

    # Pack Q|K|V weights/biases (one matmul in-kernel); fold 1/sqrt(hd) into Q;
    # store MXU weights as bf16 (halves weight DMA bytes, native MXU dtype).
    wqkv = jnp.concatenate([params["wq"] * inv_scale, params["wk"], params["wv"]],
                           axis=1).astype(jnp.bfloat16)              # (H, 3H)
    bqkv = jnp.concatenate([params["bq"] * inv_scale, params["bk"], params["bv"]],
                           axis=1)                                    # (1, 3H) f32
    wo = params["wo"].astype(jnp.bfloat16)
    w1 = params["w1"].astype(jnp.bfloat16)
    w2 = params["w2"].astype(jnp.bfloat16)

    # Trace-time constant block-diagonal additive bias (keeps attention within
    # each batch element so the whole (B,S) problem runs as one (T,T) slab).
    block_keep = np.kron(np.eye(B, dtype=np.float32), np.ones((S, S), np.float32))
    block_neg = jnp.asarray(np.where(block_keep > 0.0, 0.0, -1e10), jnp.float32)

    # All vectors + mask + block-diag bias in ONE (24, 128) slab -> one DMA.
    rows = [
        _pad128(bqkv), _pad128(params["bo"]), _pad128(params["b1"]),
        _pad128(params["b2"]), _pad128(params["ln_g"]), _pad128(params["ln_b"]),
        _pad128(mask.reshape(1, T).astype(jnp.float32)),
        jnp.zeros((1, 128), jnp.float32),    # pad so block bias starts at sublane 8
        _pad128(block_neg),
    ]
    vecs = jnp.concatenate(rows, axis=0)     # (24, 128)

    src2d = src.reshape(T, H)                # fold batch into rows (free reshape)
    in_arrays = [src2d, wqkv, wo, w1, w2, vecs]

    out2d = pl.pallas_call(
        encoder_layer_kernel,
        out_shape=jax.ShapeDtypeStruct((T, H), jnp.float32),
        grid=(1,),                           # single invocation: no per-step overhead
        in_specs=[_full_spec(a.shape) for a in in_arrays],
        out_specs=_full_spec((T, H)),
        scratch_shapes=[pltpu.VMEM((T, HID_DIM), jnp.float32)],
        compiler_params=pltpu.CompilerParams(
            dimension_semantics=("arbitrary",)),
    )(*in_arrays)
    return out2d.reshape(B, S, H)


def ref_encoder_layer(src, mask, p):
    """Pure-JAX f32 reference (mirrors the PyTorch forward, dropout = identity)."""
    B, S, H = src.shape

    def lin(x, w, b):
        return x @ w + b

    q = lin(src, p["wq"], p["bq"]).reshape(B, S, N_HEADS, HEAD_DIM).transpose(0, 2, 1, 3)
    k = lin(src, p["wk"], p["bk"]).reshape(B, S, N_HEADS, HEAD_DIM).transpose(0, 2, 1, 3)
    v = lin(src, p["wv"], p["bv"]).reshape(B, S, N_HEADS, HEAD_DIM).transpose(0, 2, 1, 3)
    energy = jnp.einsum("bhqd,bhkd->bhqk", q, k) / math.sqrt(HEAD_DIM)
    energy = jnp.where(mask[:, :, None, :] == 0.0, -1e10, energy)
    attn = jax.nn.softmax(energy, axis=-1)
    x = jnp.einsum("bhqk,bhkd->bhqd", attn, v).transpose(0, 2, 1, 3).reshape(B, S, H)
    x = lin(x, p["wo"], p["bo"])

    def ln(y):
        mu = y.mean(-1, keepdims=True)
        var = ((y - mu) ** 2).mean(-1, keepdims=True)
        return (y - mu) / jnp.sqrt(var + LN_EPS) * p["ln_g"] + p["ln_b"]

    x1 = ln(src + x)
    h = lin(x1, p["w1"], p["b1"])
    h = h * 0.5 * (1.0 + jax.lax.erf(h / math.sqrt(2.0)))
    h = lin(h, p["w2"], p["b2"])
    return ln(x1 + h)


def make_params(key):
    ks = jax.random.split(key, 8)
    scale = 0.02

    def w(k, shape):
        return (scale * jax.random.normal(k, shape)).astype(jnp.float32)

    params = {
        # weights stored as (in, out) so kernels compute x @ W + b
        "wq": w(ks[0], (HID_DIM, HID_DIM)), "bq": jnp.zeros((1, HID_DIM), jnp.float32),
        "wk": w(ks[1], (HID_DIM, HID_DIM)), "bk": jnp.zeros((1, HID_DIM), jnp.float32),
        "wv": w(ks[2], (HID_DIM, HID_DIM)), "bv": jnp.zeros((1, HID_DIM), jnp.float32),
        "wo": w(ks[3], (HID_DIM, HID_DIM)), "bo": jnp.zeros((1, HID_DIM), jnp.float32),
        "ln_g": jnp.ones((1, HID_DIM), jnp.float32),
        "ln_b": jnp.zeros((1, HID_DIM), jnp.float32),
        "w1": w(ks[4], (HID_DIM, PF_DIM)), "b1": 0.01 * jnp.ones((1, PF_DIM), jnp.float32),
        "w2": w(ks[5], (PF_DIM, HID_DIM)), "b2": 0.01 * jnp.ones((1, HID_DIM), jnp.float32),
    }
    return params


if __name__ == "__main__":
    key = jax.random.PRNGKey(0)
    k_src, k_par = jax.random.split(key)

    src = jax.random.normal(k_src, (BATCH, SEQ, HID_DIM), dtype=jnp.float32)
    # mask: batch 0 fully valid; batch 1 masks the last 3 key positions
    mask = jnp.ones((BATCH, 1, SEQ), dtype=jnp.float32)
    mask = mask.at[1, 0, SEQ - 3:].set(0.0)

    params = make_params(k_par)

    out = encoder_layer(src, mask, params)
    out = jax.block_until_ready(out)

    ref = jax.block_until_ready(ref_encoder_layer(src, mask, params))
    # bf16 MXU operands + approx reciprocal -> relax the f32-reference tolerance.
    if not jnp.allclose(out, ref, rtol=1e-2, atol=1e-2):
        raise AssertionError("Pallas kernel output does not match reference")

    print("KERNEL_OK")
</pallas_src>

<mosaic_0001>
module attributes {stable_mosaic.version = 11 : i64} {
  func.func @encoder_layer_kernel(%arg0: i32, %arg1: memref<16x32xf32, #tpu.memory_space<vmem>>, %arg2: memref<32x96xbf16, #tpu.memory_space<vmem>>, %arg3: memref<32x32xbf16, #tpu.memory_space<vmem>>, %arg4: memref<32x64xbf16, #tpu.memory_space<vmem>>, %arg5: memref<64x32xbf16, #tpu.memory_space<vmem>>, %arg6: memref<24x128xf32, #tpu.memory_space<vmem>>, %arg7: memref<16x32xf32, #tpu.memory_space<vmem>>, %arg8: memref<16x32xf32, #tpu.memory_space<vmem>>) attributes {dimension_semantics = [#tpu.dimension_semantics<arbitrary>], iteration_bounds = array<i64: 1>, scalar_prefetch = 0 : i64, scratch_operands = 1 : i64, tpu.core_type = #tpu.core_type<tc>, window_params = [{pipeline_mode = #tpu.pipeline_mode<synchronous>, transform_indices = @transform_0, window_bounds = array<i64: 16, 32>}, {pipeline_mode = #tpu.pipeline_mode<synchronous>, transform_indices = @transform_1, window_bounds = array<i64: 32, 96>}, {pipeline_mode = #tpu.pipeline_mode<synchronous>, transform_indices = @transform_2, window_bounds = array<i64: 32, 32>}, {pipeline_mode = #tpu.pipeline_mode<synchronous>, transform_indices = @transform_3, window_bounds = array<i64: 32, 64>}, {pipeline_mode = #tpu.pipeline_mode<synchronous>, transform_indices = @transform_4, window_bounds = array<i64: 64, 32>}, {pipeline_mode = #tpu.pipeline_mode<synchronous>, transform_indices = @transform_5, window_bounds = array<i64: 24, 128>}, {pipeline_mode = #tpu.pipeline_mode<synchronous>, transform_indices = @transform_6, window_bounds = array<i64: 16, 32>}]} {
    %c0 = arith.constant 0 : index
    %c0_0 = arith.constant 0 : index
    %0 = vector.load %arg1[%c0, %c0_0] : memref<16x32xf32, #tpu.memory_space<vmem>>, vector<16x32xf32>
    %c0_1 = arith.constant 0 : index
    %c0_2 = arith.constant 0 : index
    %1 = vector.load %arg6[%c0_1, %c0_2] : memref<24x128xf32, #tpu.memory_space<vmem>>, vector<1x96xf32>
    %c1 = arith.constant 1 : index
    %c0_3 = arith.constant 0 : index
    %2 = vector.load %arg6[%c1, %c0_3] : memref<24x128xf32, #tpu.memory_space<vmem>>, vector<1x32xf32>
    %c2 = arith.constant 2 : index
    %c0_4 = arith.constant 0 : index
    %3 = vector.load %arg6[%c2, %c0_4] : memref<24x128xf32, #tpu.memory_space<vmem>>, vector<1x64xf32>
    %c3 = arith.constant 3 : index
    %c0_5 = arith.constant 0 : index
    %4 = vector.load %arg6[%c3, %c0_5] : memref<24x128xf32, #tpu.memory_space<vmem>>, vector<1x32xf32>
    %c4 = arith.constant 4 : index
    %c0_6 = arith.constant 0 : index
    %5 = vector.load %arg6[%c4, %c0_6] : memref<24x128xf32, #tpu.memory_space<vmem>>, vector<1x32xf32>
    %c5 = arith.constant 5 : index
    %c0_7 = arith.constant 0 : index
    %6 = vector.load %arg6[%c5, %c0_7] : memref<24x128xf32, #tpu.memory_space<vmem>>, vector<1x32xf32>
    %c6 = arith.constant 6 : index
    %c0_8 = arith.constant 0 : index
    %7 = vector.load %arg6[%c6, %c0_8] : memref<24x128xf32, #tpu.memory_space<vmem>>, vector<1x16xf32>
    %c8 = arith.constant 8 : index
    %c0_9 = arith.constant 0 : index
    %8 = vector.load %arg6[%c8, %c0_9] : memref<24x128xf32, #tpu.memory_space<vmem>>, vector<16x16xf32>
    %9 = arith.truncf %0 : vector<16x32xf32> to vector<16x32xbf16>
    %c0_10 = arith.constant 0 : index
    %c0_11 = arith.constant 0 : index
    %10 = vector.load %arg2[%c0_10, %c0_11] : memref<32x96xbf16, #tpu.memory_space<vmem>>, vector<32x96xbf16>
    %cst = arith.constant dense<0.000000e+00> : vector<16x96xf32>
    %11 = tpu.matmul %9, %10, %cst {dimension_numbers = #tpu.dot_dimension_numbers<[1], [0], [0], [1], [0, 0, 1, 1], [], []>} : vector<16x32xbf16>, vector<32x96xbf16>, vector<16x96xf32> -> vector<16x96xf32>
    %12 = vector.broadcast %1 : vector<1x96xf32> to vector<16x96xf32>
    %13 = arith.addf %11, %12 : vector<16x96xf32>
    %cst_12 = arith.constant 0.000000e+00 : f32
    %14 = vector.broadcast %cst_12 : f32 to vector<1x16xf32>
    %15 = arith.cmpf one, %7, %14 : vector<1x16xf32>
    %cst_13 = arith.constant 0.000000e+00 : f32
    %cst_14 = arith.constant -1.000000e+10 : f32
    %16 = vector.broadcast %cst_13 : f32 to vector<1x16xf32>
    %17 = vector.broadcast %cst_14 : f32 to vector<1x16xf32>
    %18 = arith.select %15, %16, %17 : vector<1x16xi1>, vector<1x16xf32>
    %19 = vector.broadcast %18 : vector<1x16xf32> to vector<16x16xf32>
    %20 = arith.addf %19, %8 : vector<16x16xf32>
    %21 = vector.extract_strided_slice %13 {offsets = [0, 0], sizes = [16, 8], strides = [1, 1]} : vector<16x96xf32> to vector<16x8xf32>
    %22 = arith.truncf %21 : vector<16x8xf32> to vector<16x8xbf16>
    %23 = vector.extract_strided_slice %13 {offsets = [0, 32], sizes = [16, 8], strides = [1, 1]} : vector<16x96xf32> to vector<16x8xf32>
    %24 = arith.truncf %23 : vector<16x8xf32> to vector<16x8xbf16>
    %25 = vector.extract_strided_slice %13 {offsets = [0, 64], sizes = [16, 8], strides = [1, 1]} : vector<16x96xf32> to vector<16x8xf32>
    %26 = arith.truncf %25 : vector<16x8xf32> to vector<16x8xbf16>
    %cst_15 = arith.constant dense<0.000000e+00> : vector<16x16xf32>
    %27 = tpu.matmul %22, %24, %cst_15 {dimension_numbers = #tpu.dot_dimension_numbers<[1], [1], [0], [0], [0, 0, 1, 0], [], []>} : vector<16x8xbf16>, vector<16x8xbf16>, vector<16x16xf32> -> vector<16x16xf32>
    %28 = arith.addf %27, %20 : vector<16x16xf32>
    %cst_16 = arith.constant dense<0xFF800000> : vector<16xf32>
    %29 = vector.multi_reduction <maximumf>, %28, %cst_16 [1] : vector<16x16xf32> to vector<16xf32>
    %30 = vector.shape_cast %29 : vector<16xf32> to vector<16x1xf32>
    %31 = vector.broadcast %30 : vector<16x1xf32> to vector<16x16xf32>
    %32 = arith.subf %28, %31 : vector<16x16xf32>
    %33 = math.exp %32 : vector<16x16xf32>
    %cst_17 = arith.constant dense<0.000000e+00> : vector<16xf32>
    %34 = vector.multi_reduction <add>, %33, %cst_17 [1] : vector<16x16xf32> to vector<16xf32>
    %35 = vector.shape_cast %34 : vector<16xf32> to vector<16x1xf32>
    %36 = tpu.reciprocal %35 {approx = true} : vector<16x1xf32> -> vector<16x1xf32>
    %37 = vector.broadcast %36 : vector<16x1xf32> to vector<16x16xf32>
    %38 = arith.mulf %33, %37 : vector<16x16xf32>
    %39 = arith.truncf %38 : vector<16x16xf32> to vector<16x16xbf16>
    %cst_18 = arith.constant dense<0.000000e+00> : vector<16x8xf32>
    %40 = tpu.matmul %39, %26, %cst_18 {dimension_numbers = #tpu.dot_dimension_numbers<[1], [0], [0], [1], [0, 0, 1, 1], [], []>} : vector<16x16xbf16>, vector<16x8xbf16>, vector<16x8xf32> -> vector<16x8xf32>
    %c0_19 = arith.constant 0 : index
    %c0_20 = arith.constant 0 : index
    %41 = vector.load %arg8[%c0_19, %c0_20] : memref<16x32xf32, #tpu.memory_space<vmem>>, vector<16x8xf32>
    tpu.vector_store %arg8[%c0_19, %c0_20], %40 {strides = array<i32>} : memref<16x32xf32, #tpu.memory_space<vmem>>, vector<16x8xf32>,
    %42 = vector.extract_strided_slice %13 {offsets = [0, 8], sizes = [16, 8], strides = [1, 1]} : vector<16x96xf32> to vector<16x8xf32>
    %43 = arith.truncf %42 : vector<16x8xf32> to vector<16x8xbf16>
    %44 = vector.extract_strided_slice %13 {offsets = [0, 40], sizes = [16, 8], strides = [1, 1]} : vector<16x96xf32> to vector<16x8xf32>
    %45 = arith.truncf %44 : vector<16x8xf32> to vector<16x8xbf16>
    %46 = vector.extract_strided_slice %13 {offsets = [0, 72], sizes = [16, 8], strides = [1, 1]} : vector<16x96xf32> to vector<16x8xf32>
    %47 = arith.truncf %46 : vector<16x8xf32> to vector<16x8xbf16>
    %cst_21 = arith.constant dense<0.000000e+00> : vector<16x16xf32>
    %48 = tpu.matmul %43, %45, %cst_21 {dimension_numbers = #tpu.dot_dimension_numbers<[1], [1], [0], [0], [0, 0, 1, 0], [], []>} : vector<16x8xbf16>, vector<16x8xbf16>, vector<16x16xf32> -> vector<16x16xf32>
    %49 = arith.addf %48, %20 : vector<16x16xf32>
    %cst_22 = arith.constant dense<0xFF800000> : vector<16xf32>
    %50 = vector.multi_reduction <maximumf>, %49, %cst_22 [1] : vector<16x16xf32> to vector<16xf32>
    %51 = vector.shape_cast %50 : vector<16xf32> to vector<16x1xf32>
    %52 = vector.broadcast %51 : vector<16x1xf32> to vector<16x16xf32>
    %53 = arith.subf %49, %52 : vector<16x16xf32>
    %54 = math.exp %53 : vector<16x16xf32>
    %cst_23 = arith.constant dense<0.000000e+00> : vector<16xf32>
    %55 = vector.multi_reduction <add>, %54, %cst_23 [1] : vector<16x16xf32> to vector<16xf32>
    %56 = vector.shape_cast %55 : vector<16xf32> to vector<16x1xf32>
    %57 = tpu.reciprocal %56 {approx = true} : vector<16x1xf32> -> vector<16x1xf32>
    %58 = vector.broadcast %57 : vector<16x1xf32> to vector<16x16xf32>
    %59 = arith.mulf %54, %58 : vector<16x16xf32>
    %60 = arith.truncf %59 : vector<16x16xf32> to vector<16x16xbf16>
    %cst_24 = arith.constant dense<0.000000e+00> : vector<16x8xf32>
    %61 = tpu.matmul %60, %47, %cst_24 {dimension_numbers = #tpu.dot_dimension_numbers<[1], [0], [0], [1], [0, 0, 1, 1], [], []>} : vector<16x16xbf16>, vector<16x8xbf16>, vector<16x8xf32> -> vector<16x8xf32>
    %c0_25 = arith.constant 0 : index
    %c8_26 = arith.constant 8 : index
    %62 = vector.load %arg8[%c0_25, %c8_26] : memref<16x32xf32, #tpu.memory_space<vmem>>, vector<16x8xf32>
    tpu.vector_store %arg8[%c0_25, %c8_26], %61 {strides = array<i32>} : memref<16x32xf32, #tpu.memory_space<vmem>>, vector<16x8xf32>,
    %63 = vector.extract_strided_slice %13 {offsets = [0, 16], sizes = [16, 8], strides = [1, 1]} : vector<16x96xf32> to vector<16x8xf32>
    %64 = arith.truncf %63 : vector<16x8xf32> to vector<16x8xbf16>
    %65 = vector.extract_strided_slice %13 {offsets = [0, 48], sizes = [16, 8], strides = [1, 1]} : vector<16x96xf32> to vector<16x8xf32>
    %66 = arith.truncf %65 : vector<16x8xf32> to vector<16x8xbf16>
    %67 = vector.extract_strided_slice %13 {offsets = [0, 80], sizes = [16, 8], strides = [1, 1]} : vector<16x96xf32> to vector<16x8xf32>
    %68 = arith.truncf %67 : vector<16x8xf32> to vector<16x8xbf16>
    %cst_27 = arith.constant dense<0.000000e+00> : vector<16x16xf32>
    %69 = tpu.matmul %64, %66, %cst_27 {dimension_numbers = #tpu.dot_dimension_numbers<[1], [1], [0], [0], [0, 0, 1, 0], [], []>} : vector<16x8xbf16>, vector<16x8xbf16>, vector<16x16xf32> -> vector<16x16xf32>
    %70 = arith.addf %69, %20 : vector<16x16xf32>
    %cst_28 = arith.constant dense<0xFF800000> : vector<16xf32>
    %71 = vector.multi_reduction <maximumf>, %70, %cst_28 [1] : vector<16x16xf32> to vector<16xf32>
    %72 = vector.shape_cast %71 : vector<16xf32> to vector<16x1xf32>
    %73 = vector.broadcast %72 : vector<16x1xf32> to vector<16x16xf32>
    %74 = arith.subf %70, %73 : vector<16x16xf32>
    %75 = math.exp %74 : vector<16x16xf32>
    %cst_29 = arith.constant dense<0.000000e+00> : vector<16xf32>
    %76 = vector.multi_reduction <add>, %75, %cst_29 [1] : vector<16x16xf32> to vector<16xf32>
    %77 = vector.shape_cast %76 : vector<16xf32> to vector<16x1xf32>
    %78 = tpu.reciprocal %77 {approx = true} : vector<16x1xf32> -> vector<16x1xf32>
    %79 = vector.broadcast %78 : vector<16x1xf32> to vector<16x16xf32>
    %80 = arith.mulf %75, %79 : vector<16x16xf32>
    %81 = arith.truncf %80 : vector<16x16xf32> to vector<16x16xbf16>
    %cst_30 = arith.constant dense<0.000000e+00> : vector<16x8xf32>
    %82 = tpu.matmul %81, %68, %cst_30 {dimension_numbers = #tpu.dot_dimension_numbers<[1], [0], [0], [1], [0, 0, 1, 1], [], []>} : vector<16x16xbf16>, vector<16x8xbf16>, vector<16x8xf32> -> vector<16x8xf32>
    %c0_31 = arith.constant 0 : index
    %c16 = arith.constant 16 : index
    %83 = vector.load %arg8[%c0_31, %c16] : memref<16x32xf32, #tpu.memory_space<vmem>>, vector<16x8xf32>
    tpu.vector_store %arg8[%c0_31, %c16], %82 {strides = array<i32>} : memref<16x32xf32, #tpu.memory_space<vmem>>, vector<16x8xf32>,
    %84 = vector.extract_strided_slice %13 {offsets = [0, 24], sizes = [16, 8], strides = [1, 1]} : vector<16x96xf32> to vector<16x8xf32>
    %85 = arith.truncf %84 : vector<16x8xf32> to vector<16x8xbf16>
    %86 = vector.extract_strided_slice %13 {offsets = [0, 56], sizes = [16, 8], strides = [1, 1]} : vector<16x96xf32> to vector<16x8xf32>
    %87 = arith.truncf %86 : vector<16x8xf32> to vector<16x8xbf16>
    %88 = vector.extract_strided_slice %13 {offsets = [0, 88], sizes = [16, 8], strides = [1, 1]} : vector<16x96xf32> to vector<16x8xf32>
    %89 = arith.truncf %88 : vector<16x8xf32> to vector<16x8xbf16>
    %cst_32 = arith.constant dense<0.000000e+00> : vector<16x16xf32>
    %90 = tpu.matmul %85, %87, %cst_32 {dimension_numbers = #tpu.dot_dimension_numbers<[1], [1], [0], [0], [0, 0, 1, 0], [], []>} : vector<16x8xbf16>, vector<16x8xbf16>, vector<16x16xf32> -> vector<16x16xf32>
    %91 = arith.addf %90, %20 : vector<16x16xf32>
    %cst_33 = arith.constant dense<0xFF800000> : vector<16xf32>
    %92 = vector.multi_reduction <maximumf>, %91, %cst_33 [1] : vector<16x16xf32> to vector<16xf32>
    %93 = vector.shape_cast %92 : vector<16xf32> to vector<16x1xf32>
    %94 = vector.broadcast %93 : vector<16x1xf32> to vector<16x16xf32>
    %95 = arith.subf %91, %94 : vector<16x16xf32>
    %96 = math.exp %95 : vector<16x16xf32>
    %cst_34 = arith.constant dense<0.000000e+00> : vector<16xf32>
    %97 = vector.multi_reduction <add>, %96, %cst_34 [1] : vector<16x16xf32> to vector<16xf32>
    %98 = vector.shape_cast %97 : vector<16xf32> to vector<16x1xf32>
    %99 = tpu.reciprocal %98 {approx = true} : vector<16x1xf32> -> vector<16x1xf32>
    %100 = vector.broadcast %99 : vector<16x1xf32> to vector<16x16xf32>
    %101 = arith.mulf %96, %100 : vector<16x16xf32>
    %102 = arith.truncf %101 : vector<16x16xf32> to vector<16x16xbf16>
    %cst_35 = arith.constant dense<0.000000e+00> : vector<16x8xf32>
    %103 = tpu.matmul %102, %89, %cst_35 {dimension_numbers = #tpu.dot_dimension_numbers<[1], [0], [0], [1], [0, 0, 1, 1], [], []>} : vector<16x16xbf16>, vector<16x8xbf16>, vector<16x8xf32> -> vector<16x8xf32>
    %c0_36 = arith.constant 0 : index
    %c24 = arith.constant 24 : index
    %104 = vector.load %arg8[%c0_36, %c24] : memref<16x32xf32, #tpu.memory_space<vmem>>, vector<16x8xf32>
    tpu.vector_store %arg8[%c0_36, %c24], %103 {strides = array<i32>} : memref<16x32xf32, #tpu.memory_space<vmem>>, vector<16x8xf32>,
    %c0_37 = arith.constant 0 : index
    %c0_38 = arith.constant 0 : index
    %105 = vector.load %arg8[%c0_37, %c0_38] : memref<16x32xf32, #tpu.memory_space<vmem>>, vector<16x32xf32>
    %106 = arith.truncf %105 : vector<16x32xf32> to vector<16x32xbf16>
    %c0_39 = arith.constant 0 : index
    %c0_40 = arith.constant 0 : index
    %107 = vector.load %arg3[%c0_39, %c0_40] : memref<32x32xbf16, #tpu.memory_space<vmem>>, vector<32x32xbf16>
    %cst_41 = arith.constant dense<0.000000e+00> : vector<16x32xf32>
    %108 = tpu.matmul %106, %107, %cst_41 {dimension_numbers = #tpu.dot_dimension_numbers<[1], [0], [0], [1], [0, 0, 1, 1], [], []>} : vector<16x32xbf16>, vector<32x32xbf16>, vector<16x32xf32> -> vector<16x32xf32>
    %109 = vector.broadcast %2 : vector<1x32xf32> to vector<16x32xf32>
    %110 = arith.addf %108, %109 : vector<16x32xf32>
    %111 = arith.addf %0, %110 : vector<16x32xf32>
    %cst_42 = arith.constant dense<0.000000e+00> : vector<16xf32>
    %112 = vector.multi_reduction <add>, %111, %cst_42 [1] : vector<16x32xf32> to vector<16xf32>
    %113 = vector.shape_cast %112 : vector<16xf32> to vector<16x1xf32>
    %cst_43 = arith.constant 3.200000e+01 : f32
    %114 = vector.broadcast %cst_43 : f32 to vector<16x1xf32>
    %115 = arith.divf %113, %114 : vector<16x1xf32>
    %116 = arith.mulf %111, %111 : vector<16x32xf32>
    %cst_44 = arith.constant dense<0.000000e+00> : vector<16xf32>
    %117 = vector.multi_reduction <add>, %116, %cst_44 [1] : vector<16x32xf32> to vector<16xf32>
    %118 = vector.shape_cast %117 : vector<16xf32> to vector<16x1xf32>
    %cst_45 = arith.constant 3.200000e+01 : f32
    %119 = vector.broadcast %cst_45 : f32 to vector<16x1xf32>
    %120 = arith.divf %118, %119 : vector<16x1xf32>
    %121 = arith.mulf %115, %115 : vector<16x1xf32>
    %122 = arith.subf %120, %121 : vector<16x1xf32>
    %cst_46 = arith.constant 9.99999974E-6 : f32
    %123 = vector.broadcast %cst_46 : f32 to vector<16x1xf32>
    %124 = arith.addf %122, %123 : vector<16x1xf32>
    %125 = math.rsqrt %124 : vector<16x1xf32>
    %126 = vector.broadcast %115 : vector<16x1xf32> to vector<16x32xf32>
    %127 = arith.subf %111, %126 : vector<16x32xf32>
    %128 = vector.broadcast %125 : vector<16x1xf32> to vector<16x32xf32>
    %129 = vector.broadcast %5 : vector<1x32xf32> to vector<16x32xf32>
    %130 = arith.mulf %128, %129 : vector<16x32xf32>
    %131 = arith.mulf %127, %130 : vector<16x32xf32>
    %132 = vector.broadcast %6 : vector<1x32xf32> to vector<16x32xf32>
    %133 = arith.addf %131, %132 : vector<16x32xf32>
    %134 = arith.truncf %133 : vector<16x32xf32> to vector<16x32xbf16>
    %c0_47 = arith.constant 0 : index
    %c0_48 = arith.constant 0 : index
    %135 = vector.load %arg4[%c0_47, %c0_48] : memref<32x64xbf16, #tpu.memory_space<vmem>>, vector<32x64xbf16>
    %cst_49 = arith.constant dense<0.000000e+00> : vector<16x64xf32>
    %136 = tpu.matmul %134, %135, %cst_49 {dimension_numbers = #tpu.dot_dimension_numbers<[1], [0], [0], [1], [0, 0, 1, 1], [], []>} : vector<16x32xbf16>, vector<32x64xbf16>, vector<16x64xf32> -> vector<16x64xf32>
    %137 = vector.broadcast %3 : vector<1x64xf32> to vector<16x64xf32>
    %138 = arith.addf %136, %137 : vector<16x64xf32>
    %cst_50 = arith.constant 5.000000e-01 : f32
    %139 = vector.broadcast %cst_50 : f32 to vector<16x64xf32>
    %140 = arith.mulf %138, %139 : vector<16x64xf32>
    %cst_51 = arith.constant 0.707106769 : f32
    %141 = vector.broadcast %cst_51 : f32 to vector<16x64xf32>
    %142 = arith.mulf %138, %141 : vector<16x64xf32>
    %143 = math.erf %142 : vector<16x64xf32>
    %cst_52 = arith.constant 1.000000e+00 : f32
    %144 = vector.broadcast %cst_52 : f32 to vector<16x64xf32>
    %145 = arith.addf %144, %143 : vector<16x64xf32>
    %146 = arith.mulf %140, %145 : vector<16x64xf32>
    %147 = arith.truncf %146 : vector<16x64xf32> to vector<16x64xbf16>
    %c0_53 = arith.constant 0 : index
    %c0_54 = arith.constant 0 : index
    %148 = vector.load %arg5[%c0_53, %c0_54] : memref<64x32xbf16, #tpu.memory_space<vmem>>, vector<64x32xbf16>
    %cst_55 = arith.constant dense<0.000000e+00> : vector<16x32xf32>
    %149 = tpu.matmul %147, %148, %cst_55 {dimension_numbers = #tpu.dot_dimension_numbers<[1], [0], [0], [1], [0, 0, 1, 1], [], []>} : vector<16x64xbf16>, vector<64x32xbf16>, vector<16x32xf32> -> vector<16x32xf32>
    %150 = vector.broadcast %4 : vector<1x32xf32> to vector<16x32xf32>
    %151 = arith.addf %149, %150 : vector<16x32xf32>
    %152 = arith.addf %133, %151 : vector<16x32xf32>
    %cst_56 = arith.constant dense<0.000000e+00> : vector<16xf32>
    %153 = vector.multi_reduction <add>, %152, %cst_56 [1] : vector<16x32xf32> to vector<16xf32>
    %154 = vector.shape_cast %153 : vector<16xf32> to vector<16x1xf32>
    %cst_57 = arith.constant 3.200000e+01 : f32
    %155 = vector.broadcast %cst_57 : f32 to vector<16x1xf32>
    %156 = arith.divf %154, %155 : vector<16x1xf32>
    %157 = arith.mulf %152, %152 : vector<16x32xf32>
    %cst_58 = arith.constant dense<0.000000e+00> : vector<16xf32>
    %158 = vector.multi_reduction <add>, %157, %cst_58 [1] : vector<16x32xf32> to vector<16xf32>
    %159 = vector.shape_cast %158 : vector<16xf32> to vector<16x1xf32>
    %cst_59 = arith.constant 3.200000e+01 : f32
    %160 = vector.broadcast %cst_59 : f32 to vector<16x1xf32>
    %161 = arith.divf %159, %160 : vector<16x1xf32>
    %162 = arith.mulf %156, %156 : vector<16x1xf32>
    %163 = arith.subf %161, %162 : vector<16x1xf32>
    %cst_60 = arith.constant 9.99999974E-6 : f32
    %164 = vector.broadcast %cst_60 : f32 to vector<16x1xf32>
    %165 = arith.addf %163, %164 : vector<16x1xf32>
    %166 = math.rsqrt %165 : vector<16x1xf32>
    %167 = vector.broadcast %156 : vector<16x1xf32> to vector<16x32xf32>
    %168 = arith.subf %152, %167 : vector<16x32xf32>
    %169 = vector.broadcast %166 : vector<16x1xf32> to vector<16x32xf32>
    %170 = vector.broadcast %5 : vector<1x32xf32> to vector<16x32xf32>
    %171 = arith.mulf %169, %170 : vector<16x32xf32>
    %172 = arith.mulf %168, %171 : vector<16x32xf32>
    %173 = vector.broadcast %6 : vector<1x32xf32> to vector<16x32xf32>
    %174 = arith.addf %172, %173 : vector<16x32xf32>
    %c0_61 = arith.constant 0 : index
    %c0_62 = arith.constant 0 : index
    %175 = vector.load %arg7[%c0_61, %c0_62] : memref<16x32xf32, #tpu.memory_space<vmem>>, vector<16x32xf32>
    tpu.vector_store %arg7[%c0_61, %c0_62], %174 {strides = array<i32>} : memref<16x32xf32, #tpu.memory_space<vmem>>, vector<16x32xf32>,
    return
  }
  func.func @transform_0(%arg0: i32) -> (i32, i32) {
    %c0_i32 = arith.constant 0 : i32
    %c0_i32_0 = arith.constant 0 : i32
    %c0_i32_1 = arith.constant 0 : i32
    return %c0_i32, %c0_i32_0 : i32, i32
  }
  func.func @transform_1(%arg0: i32) -> (i32, i32) {
    %c0_i32 = arith.constant 0 : i32
    %c0_i32_0 = arith.constant 0 : i32
    %c0_i32_1 = arith.constant 0 : i32
    return %c0_i32, %c0_i32_0 : i32, i32
  }
  func.func @transform_2(%arg0: i32) -> (i32, i32) {
    %c0_i32 = arith.constant 0 : i32
    %c0_i32_0 = arith.constant 0 : i32
    %c0_i32_1 = arith.constant 0 : i32
    return %c0_i32, %c0_i32_0 : i32, i32
  }
  func.func @transform_3(%arg0: i32) -> (i32, i32) {
    %c0_i32 = arith.constant 0 : i32
    %c0_i32_0 = arith.constant 0 : i32
    %c0_i32_1 = arith.constant 0 : i32
    return %c0_i32, %c0_i32_0 : i32, i32
  }
  func.func @transform_4(%arg0: i32) -> (i32, i32) {
    %c0_i32 = arith.constant 0 : i32
    %c0_i32_0 = arith.constant 0 : i32
    %c0_i32_1 = arith.constant 0 : i32
    return %c0_i32, %c0_i32_0 : i32, i32
  }
  func.func @transform_5(%arg0: i32) -> (i32, i32) {
    %c0_i32 = arith.constant 0 : i32
    %c0_i32_0 = arith.constant 0 : i32
    %c0_i32_1 = arith.constant 0 : i32
    return %c0_i32, %c0_i32_0 : i32, i32
  }
  func.func @transform_6(%arg0: i32) -> (i32, i32) {
    %c0_i32 = arith.constant 0 : i32
    %c0_i32_0 = arith.constant 0 : i32
    %c0_i32_1 = arith.constant 0 : i32
    return %c0_i32, %c0_i32_0 : i32, i32
  }
}

</mosaic_0001>

<bundles_post_ra>
// kernel: tpu_custom_call.1
= control target key start
LH: loop header
LB: loop body
LE: loop exit
PB: predicated region body
PF: predicated region fallthrough
CT: control target
= control target key end

     0   :  { %11 = vsyncpa [#allocation4], 0  ;;  %s1554_s0 = inlined_call_operand.vmem [shape: f32[16,32], index: 0, kind: input, shape index: {}]   ;;  %s1555_s1 = inlined_call_operand.hbm [shape: bf16[32,96], index: 1, kind: input, shape index: {}]   ;;  %s1556_s2 = inlined_call_operand.hbm [shape: bf16[32,32], index: 2, kind: input, shape index: {}]   ;;  %s1557_s3 = inlined_call_operand.hbm [shape: bf16[32,64], index: 3, kind: input, shape index: {}]   ;;  %s1558_s4 = inlined_call_operand.vmem [shape: bf16[64,32], index: 4, kind: input, shape index: {}]   ;;  %s1559_s5 = inlined_call_operand.vmem [shape: f32[24,128], index: 5, kind: input, shape index: {}]   ;;  %s1560_s6 = inlined_call_operand.hbm [shape: f32[16,32], index: 6, kind: output, shape index: {}]  }
   0x1   :  { %12 = vsyncpa [#allocation7], 0 }
   0x2   :  { %13 = vsyncpa [#allocation5], 0  ;;  %s1302_s21 = smov [#allocation6]   ;;  %s1303_s23 = smov [#allocation3]  }
   0x3   :  { %s33_s22 = sshll.u32 %s1302_s21, 4  ;;  %s21_s24 = sshll.u32 %s1303_s23, 4  ;;  %s34_s22 = int_to_ptr.vmem [resolvable:$true] %s33_s22  ;;  %s22_s24 = int_to_ptr.vmem [resolvable:$true] %s21_s24 }
   0x4   :  { %s1224_s25 = scalar_lea.vmem %s34_s22, 256  ;;  %p1229_p1 = scmp.lt.s32.totalorder %s34_s22, %s34_s22 }
   0x5   :  { %p1225_p0 = scmp.ne.s32.totalorder %s34_s22, %s1224_s25  ;;  %p1230_p2 = scmp.lt.s32.totalorder %s1224_s25, %s1224_s25 }
   0x7   :  { %p1231_p3 = por %p1230_p2, %p1229_p1 }
   0x9   :  { %p1232_p4 = pnand %p1231_p3, %p1225_p0 }
   0xb   :  { %1235 = shalt.err (!%p1232_p4)
}
   0xc   :  { %s1304_s26 = smov 64   ;;  %s1305_s27 = smov 4  }
   0xd   :  { %39 = dma.hbm_to_vmem [thread:$0]  %s1556_s2, 256, %s34_s22, [#allocation7], %s1304_s26, %s1304_s26, %s1305_s27  }
   0xe   :  { %s1244_s30 = scalar_lea.vmem %s22_s24, 256  ;;  %p1249_p6 = scmp.lt.s32.totalorder %s22_s24, %s22_s24 }
   0xf   :  { %p1245_p5 = scmp.ne.s32.totalorder %s22_s24, %s1244_s30  ;;  %p1250_p7 = scmp.lt.s32.totalorder %s1244_s30, %s1244_s30 }
  0x11   :  { %p1251_p8 = por %p1250_p7, %p1249_p6 }
  0x13   :  { %p1252_p9 = pnand %p1251_p8, %p1245_p5 }
  0x15   :  { %1255 = shalt.err (!%p1252_p9)
}
  0x16   :  { %27 = dma.hbm_to_vmem [thread:$0]  %s1555_s1, 256, %s22_s24, [#allocation4], %s1304_s26, %s1304_s26, %s1305_s27  }
  0x17   :  { %s1306_s9 = smov [#allocation8]  }
  0x18   :  { %s45_s10 = sshll.u32 %s1306_s9, 4  ;;  %s46_s10 = int_to_ptr.vmem [resolvable:$true] %s45_s10 }
  0x19   :  { %s1264_s11 = scalar_lea.vmem %s46_s10, 256  ;;  %p1269_p11 = scmp.lt.s32.totalorder %s46_s10, %s46_s10 }
  0x1a   :  { %p1265_p10 = scmp.ne.s32.totalorder %s46_s10, %s1264_s11  ;;  %p1270_p12 = scmp.lt.s32.totalorder %s1264_s11, %s1264_s11 }
  0x1c   :  { %p1271_p13 = por %p1270_p12, %p1269_p11 }
  0x1e   :  { %p1272_p0 = pnand %p1271_p13, %p1265_p10 }
  0x20   :  { %1275 = shalt.err (!%p1272_p0)
}
  0x21   :  { %51 = dma.hbm_to_vmem [thread:$0]  %s1557_s3, 256, %s46_s10, [#allocation7], %s1304_s26, %s1304_s26, %s1305_s27  }
  0x22   :  { %1296 = dma.done.wait [#allocation4], 256  }
  0x23   :  { %1297 = vsyncadd [#allocation4], 4294967040 }
  0x24   :  { %1298 = dma.done.wait [#allocation7], 512  }
  0x25   :  { %1299 = vsyncadd [#allocation7], 4294966784  ;;  %v1307_v0 = vmov 0.0   ;;  %vm1308_vm0 = vmmov 0   ;;  %v1162_v1 = vld [vmem:[#allocation3 + $0x8] sm:$0xff]   ;;  %v1163_v2 = vld [vmem:[#allocation3] sm:$0xff]   ;;  %v145_v25 = vlaneseq }
  0x26   :  { %1055 = vmatprep.subr.bf16.mxu0 %v1307_v0  ;;  %1059 = vmatprep.mubr.msk.bf16.mxu0 %vm1308_vm0, %v1307_v0  ;;  %v1384_v3 = vld [vmem:[%s1554_s0] sm:$0xff]  ;;  %v1389_v4 = vld [vmem:[%s1554_s0 + $0x8] sm:$0xff]  ;;  %vm98_vm1 = vcmask 261120   ;;  %s1309_s0 = smov 120   ;;  %s1310_s17 = smov 96   ;;  %vm155_vm2 = vcmask 64512  }
  0x27   :  { %1063 = vmatprep.subr.bf16.mxu1 %v1307_v0  ;;  %1065 = vmatprep.mubr.msk.bf16.mxu1 %vm1308_vm0, %v1307_v0  ;;  %v77_v5 = vpack.c.bf16 %v1389_v4, %v1384_v3  ;;  %v997_v7 = vld [vmem:[%s1559_s5] ss:$0 sm:$0xff]  ;;  %s1311_s18 = smov 80   ;;  %s1312_s19 = smov 88   ;;  %v74_v26 = vld [vmem:[%s1559_s5 + $0x6] sm:$0x1] }
  0x28   :  { %1056 = vmatpush3.bf16.msra.mxu0 %v1162_v1  ;;  %s1313_s20 = smov 72   ;;  %s1314_s21 = smov 112   ;;  %v146_v27 = vshrl.u32 %v145_v25, 7  ;;  %vm143_vm3 = vcmp.ne.f32.partialorder %v74_v26, 0.0  ;;  %v1316_v29 = vmov -1e+10  }
  0x29   :  { %1057 = vmatprep.subr.bf16.mxu0 %v1307_v0  ;;  %s1315_s22 = smov 104   ;;  %v144_v30 = vsel %vm143_vm3, 0.0, %v1316_v29  ;;  %v75_v32 = vld [vmem:[%s1559_s5 + $0x8] sm:$0xff]  ;;  %v76_v34 = vld [vmem:[%s1559_s5 + $0x10] sm:$0xff]  ;;  %vm203_vm4 = vcmask 130048   ;;  %s1317_s30 = smov 56  }
  0x2a   :  { %v147_v28 = vsub.s32 0, %v146_v27  ;;  %s1319_s7 = smov 40   ;;  %s1320_s8 = smov 8   ;;  %vm405_vm5 = vcmask 130112   ;;  %vm537_vm6 = vcmask 195712   ;;  %vm669_vm7 = vcmask 261312  }
  0x2b   :  { %s1321_s9 = smov 16   ;;  %s1322_s10 = smov 24   ;;  %vm896_vm8 = vcmask 523264  }
  0x2c   :  { %1058 = vmatpush3.bf16.msra.mxu0 %v1163_v2  ;;  %v148_v31 = vrot.slane %v144_v30, %v147_v28 }
  0x2d   :  { %1069 = vmatprep.subr.bf16.mxu0 %v1307_v0 }
  0x2e   :  { %v149_v33 = vadd.f32 %v148_v31, %v75_v32  ;;  %v150_v37 = vadd.f32 %v148_v31, %v76_v34 }
  0x2f   :  { %1060 = vmatmul.mubr.msk.bf16.vlgmr.msra.gmra.mxu0 %vm98_vm1, %v77_v5 }
  0x30   :  { %1071 = vmatprep.mubr.msk.bf16.mxu0 %vm1308_vm0, %v1307_v0 }
  0xef   :  { %v136_v6 = vpop.f32.mrf.mxu0 }
  0xf0   :  { %v137_v10 = vadd.f32 %v997_v7, %v136_v6 }
  0xf1   :  { %v1061_v8 = vpop.f32.mrf.mxu0 }
  0xf3   :  { %v139_v9 = vpop.f32.mrf.mxu0 }
  0xf4   :  { %v140_v11 = vadd.f32 %v997_v7, %v139_v9 }
  0xf5   :  { %v1062_v12 = vpop.f32.mrf.mxu0 }
  0xf6   :  { %v1401_v13 = vpack.c.bf16 %v140_v11, %v137_v10 }
  0xf8   :  { %276 = vrot.lane.b32.xlu1 %v1401_v13, %s1309_s0  ;;  %153 = vrot.lane.b32.xlu0 %v1401_v13, %s1310_s17 }
  0xfc   :  { %410 = vrot.lane.b32.xlu1 %v1401_v13, %s1311_s18  ;;  %278 = vrot.lane.b32.xlu0 %v1401_v13, %s1312_s19 }
 0x100   :  { %542 = vrot.lane.b32.xlu1 %v1401_v13, %s1313_s20  ;;  %408 = vrot.lane.b32.xlu0 %v1401_v13, %s1314_s21 }
 0x104   :  { %540 = vrot.lane.b32.xlu0 %v1401_v13, %s1315_s22 }
 0x16a   :  { %v154_v14 = vpop.permute.xlu0 %153  ;;  %v277_v17 = vpop.permute.xlu1 %276 }
 0x16b   :  { %v160_v15 = vsel %vm155_vm2, %v154_v14, 0 }
 0x16c   :  { %1064 = vmatpush3.bf16.xpose.msra.mxu1 %v160_v15 }
 0x16d   :  { %1075 = vmatprep.subr.bf16.mxu1 %v1307_v0 }
 0x16e   :  { %v279_v16 = vpop.permute.xlu0 %278  ;;  %v411_v19 = vpop.permute.xlu1 %410 }
 0x16f   :  { %v284_v18 = vsel %vm155_vm2, %v279_v16, 0  ;;  %v416_v20 = vsel %vm155_vm2, %v411_v19, 0 }
 0x172   :  { %v543_v21 = vpop.permute.xlu1 %542  ;;  %v409_v22 = vpop.permute.xlu0 %408 }
 0x173   :  { %1066 = vmatmul.mubr.msk.bf16.vlgmr.msra.gmra.mxu1 %vm155_vm2, %v1401_v13  ;;  %v548_v23 = vsel %vm155_vm2, %v543_v21, 0 }
 0x174   :  { %1076 = vmatpush3.bf16.xpose.msra.mxu1 %v284_v18  ;;  %1077 = vmatprep.mubr.msk.bf16.mxu1 %vm1308_vm0, %v1307_v0 }
 0x175   :  { %1087 = vmatprep.subr.bf16.mxu1 %v1307_v0 }
 0x176   :  { %v541_v24 = vpop.permute.xlu0 %540 }
 0x17b   :  { %1078 = vmatmul.mubr.msk.bf16.vlgmr.msra.gmra.mxu1 %vm155_vm2, %v277_v17 }
 0x17c   :  { %1088 = vmatpush3.bf16.xpose.msra.mxu1 %v416_v20  ;;  %1089 = vmatprep.mubr.msk.bf16.mxu1 %vm1308_vm0, %v1307_v0 }
 0x17d   :  { %1099 = vmatprep.subr.bf16.mxu1 %v1307_v0 }
 0x183   :  { %1090 = vmatmul.mubr.msk.bf16.vlgmr.msra.gmra.mxu1 %vm155_vm2, %v409_v22 }
 0x184   :  { %1100 = vmatpush3.bf16.xpose.msra.mxu1 %v548_v23  ;;  %1101 = vmatprep.mubr.msk.bf16.mxu1 %vm1308_vm0, %v1307_v0 }
 0x185   :  { %1111 = vmatprep.subr.bf16.mxu1 %v1307_v0 }
 0x18b   :  { %1102 = vmatmul.mubr.msk.bf16.vlgmr.msra.gmra.mxu1 %vm155_vm2, %v541_v24 }
 0x18c   :  { %1115 = vmatprep.mubr.msk.bf16.mxu1 %vm1308_vm0, %v1307_v0 }
 0x233   :  { %v196_v35 = vpop.f32.mrf.mxu1 }
 0x234   :  { %v197_v36 = vadd.f32 %v196_v35, %v149_v33 }
 0x235   :  { %v1067_v38 = vpop.f32.mrf.mxu1 }
 0x236   :  { %v204_v39 = vsel %vm203_vm4, %v197_v36, -inf }
 0x237   :  { %205 = vmax.xlane.f32.xlu1 %v204_v39  ;;  %v199_v40 = vpop.f32.mrf.mxu1 }
 0x238   :  { %v200_v41 = vadd.f32 %v199_v40, %v150_v37 }
 0x239   :  { %v1068_v42 = vpop.f32.mrf.mxu1 }
 0x23a   :  { %v207_v43 = vsel %vm203_vm4, %v200_v41, -inf }
 0x23b   :  { %208 = vmax.xlane.f32.xlu0 %v207_v43  ;;  %v320_v44 = vpop.f32.mrf.mxu1 }
 0x23c   :  { %v321_v45 = vadd.f32 %v320_v44, %v149_v33 }
 0x23d   :  { %v1079_v46 = vpop.f32.mrf.mxu1 }
 0x23e   :  { %v327_v47 = vsel %vm203_vm4, %v321_v45, -inf }
 0x23f   :  { %328 = vmax.xlane.f32.xlu0 %v327_v47  ;;  %v323_v48 = vpop.f32.mrf.mxu1 }
 0x240   :  { %v324_v49 = vadd.f32 %v323_v48, %v150_v37 }
 0x241   :  { %v1080_v50 = vpop.f32.mrf.mxu1 }
 0x242   :  { %v330_v51 = vsel %vm203_vm4, %v324_v49, -inf }
 0x243   :  { %331 = vmax.xlane.f32.xlu1 %v330_v51  ;;  %v452_v52 = vpop.f32.mrf.mxu1 }
 0x244   :  { %v453_v53 = vadd.f32 %v452_v52, %v149_v33 }
 0x245   :  { %v1091_v54 = vpop.f32.mrf.mxu1 }
 0x246   :  { %v459_v55 = vsel %vm203_vm4, %v453_v53, -inf }
 0x247   :  { %460 = vmax.xlane.f32.xlu0 %v459_v55  ;;  %v455_v56 = vpop.f32.mrf.mxu1 }
 0x248   :  { %v456_v57 = vadd.f32 %v455_v56, %v150_v37 }
 0x249   :  { %v1092_v58 = vpop.f32.mrf.mxu1 }
 0x24a   :  { %v462_v59 = vsel %vm203_vm4, %v456_v57, -inf }
 0x24b   :  { %463 = vmax.xlane.f32.xlu1 %v462_v59  ;;  %v584_v60 = vpop.f32.mrf.mxu1 }
 0x24c   :  { %v585_v61 = vadd.f32 %v584_v60, %v149_v33 }
 0x24d   :  { %v1103_v62 = vpop.f32.mrf.mxu1 }
 0x24e   :  { %v591_v63 = vsel %vm203_vm4, %v585_v61, -inf }
 0x24f   :  { %592 = vmax.xlane.f32.xlu0 %v591_v63  ;;  %v587_v1 = vpop.f32.mrf.mxu1 }
 0x250   :  { %v588_v2 = vadd.f32 %v587_v1, %v150_v37 }
 0x251   :  { %v1104_v5 = vpop.f32.mrf.mxu1 }
 0x252   :  { %v594_v6 = vsel %vm203_vm4, %v588_v2, -inf }
 0x253   :  { %595 = vmax.xlane.f32.xlu1 %v594_v6 }
 0x2c0   :  { %v206_v7 = vpop.xlane.xlu1 %205 }
 0x2c1   :  { %v210_v8 = vsub.f32 %v197_v36, %v206_v7 }
 0x2c3   :  { %v212_v9 = vmul.f32 1.442695, %v210_v8 }
 0x2c4   :  { %v209_v10 = vpop.xlane.xlu0 %208 }
 0x2c5   :  { %1172 = vpow2.f32 %v212_v9  ;;  %v211_v11 = vsub.f32 %v200_v41, %v209_v10 }
 0x2c7   :  { %v214_v12 = vmul.f32 1.442695, %v211_v11 }
 0x2c8   :  { %v329_v14 = vpop.xlane.xlu0 %328 }
 0x2c9   :  { %1174 = vpow2.f32 %v214_v12  ;;  %v333_v15 = vsub.f32 %v321_v45, %v329_v14 }
 0x2cb   :  { %v335_v16 = vmul.f32 1.442695, %v333_v15 }
 0x2cc   :  { %v332_v23 = vpop.xlane.xlu1 %331 }
 0x2cd   :  { %1176 = vpow2.f32 %v335_v16  ;;  %v334_v24 = vsub.f32 %v324_v49, %v332_v23 }
 0x2cf   :  { %v337_v28 = vmul.f32 1.442695, %v334_v24 }
 0x2d0   :  { %v461_v25 = vpop.xlane.xlu0 %460 }
 0x2d1   :  { %v465_v27 = vsub.f32 %v453_v53, %v461_v25  ;;  %1178 = vpow2.f32 %v337_v28  ;;  %v1164_v28 = vld [vmem:[#allocation6 + $0x8] sm:$0xff]  }
 0x2d2   :  { %v1173_v17 = vpop.eup %1172  ;;  %1112 = vmatpush3.bf16.msra.mxu1 %v1164_v28  ;;  %v1169_v28 = vld [vmem:[%s1558_s4 + $0x10] sm:$0xff]  }
 0x2d3   :  { %v216_v18 = vsel %vm203_vm4, %v1173_v17, 0.0  ;;  %v467_v32 = vmul.f32 1.442695, %v465_v27  ;;  %1113 = vmatprep.subr.bf16.mxu1 %v1307_v0 }
 0x2d4   :  { %217 = vadd.xlane.f32.xlu0 %v216_v18  ;;  %v464_v26 = vpop.xlane.xlu1 %463 }
 0x2d5   :  { %v466_v29 = vsub.f32 %v456_v57, %v464_v26  ;;  %1180 = vpow2.f32 %v467_v32 }
 0x2d6   :  { %v1175_v19 = vpop.eup %1174 }
 0x2d7   :  { %v219_v20 = vsel %vm203_vm4, %v1175_v19, 0.0  ;;  %v469_v34 = vmul.f32 1.442695, %v466_v29 }
 0x2d8   :  { %220 = vadd.xlane.f32.xlu1 %v219_v20  ;;  %v593_v30 = vpop.xlane.xlu0 %592 }
 0x2d9   :  { %v597_v33 = vsub.f32 %v585_v61, %v593_v30  ;;  %1182 = vpow2.f32 %v469_v34  ;;  %v1165_v30 = vld [vmem:[#allocation6] sm:$0xff]  }
 0x2da   :  { %v1450_v21 = vpop.eup %1176  ;;  %1114 = vmatpush3.bf16.msra.mxu1 %v1165_v30  ;;  %v1171_v30 = vld [vmem:[%s1558_s4] sm:$0xff]  }
 0x2db   :  { %v339_v22 = vsel %vm203_vm4, %v1450_v21, 0.0  ;;  %v599_v36 = vmul.f32 1.442695, %v597_v33  ;;  %1127 = vmatprep.subr.bf16.mxu1 %v1307_v0 }
 0x2dc   :  { %340 = vadd.xlane.f32.xlu0 %v339_v22  ;;  %v596_v31 = vpop.xlane.xlu1 %595 }
 0x2dd   :  { %v598_v35 = vsub.f32 %v588_v2, %v596_v31  ;;  %1184 = vpow2.f32 %v599_v36 }
 0x2de   :  { %v1179_v38 = vpop.eup %1178 }
 0x2df   :  { %v601_v37 = vmul.f32 1.442695, %v598_v35  ;;  %v342_v40 = vsel %vm203_vm4, %v1179_v38, 0.0 }
 0x2e1   :  { %1186 = vpow2.f32 %v601_v37 }
 0x2e2   :  { %v1181_v39 = vpop.eup %1180 }
 0x2e3   :  { %v471_v44 = vsel %vm203_vm4, %v1181_v39, 0.0 }
 0x2e6   :  { %v1183_v41 = vpop.eup %1182 }
 0x2e7   :  { %v474_v43 = vsel %vm203_vm4, %v1183_v41, 0.0 }
 0x2e9   :  { %350 = vrot.lane.b32.xlu1 %v1401_v13, %s1317_s30 }
 0x2ea   :  { %v1458_v42 = vpop.eup %1184 }
 0x2eb   :  { %v603_v47 = vsel %vm203_vm4, %v1458_v42, 0.0 }
 0x2ee   :  { %v1187_v45 = vpop.eup %1186 }
 0x2ef   :  { %v606_v46 = vsel %vm203_vm4, %v1187_v45, 0.0 }
 0x2f2   :  { %227 = vrot.lane.b32.xlu0 %v1401_v13, %s1304_s26  ;;  %s1318_s26 = smov 48  }
 0x30d   :  { %343 = vadd.xlane.f32.xlu1 %v342_v40 }
 0x311   :  { %475 = vadd.xlane.f32.xlu1 %v474_v43  ;;  %472 = vadd.xlane.f32.xlu0 %v471_v44 }
 0x315   :  { %607 = vadd.xlane.f32.xlu1 %v606_v46  ;;  %604 = vadd.xlane.f32.xlu0 %v603_v47  ;;  %v1009_v46 = vld [vmem:[%s1559_s5 + $0x1] ss:$0 sm:$0xff] }
 0x326   :  { %482 = vrot.lane.b32.xlu1 %v1401_v13, %s1318_s26 }
 0x32b   :  { %614 = vrot.lane.b32.xlu0 %v1401_v13, %s1319_s7 }
 0x35d   :  { %v218_v48 = vpop.xlane.xlu0 %217 }
 0x35e   :  { %1188 = vrcp.f32 %v218_v48 }
 0x361   :  { %v221_v49 = vpop.xlane.xlu1 %220 }
 0x362   :  { %1190 = vrcp.f32 %v221_v49 }
 0x365   :  { %v341_v50 = vpop.xlane.xlu0 %340  ;;  %v351_v57 = vpop.permute.xlu1 %350 }
 0x366   :  { %1192 = vrcp.f32 %v341_v50 }
 0x369   :  { %v228_v51 = vpop.permute.xlu0 %227 }
 0x36a   :  { %1070 = vmatpush3.bf16.msra.mxu0 %v228_v51 }
 0x36b   :  { %1081 = vmatprep.subr.bf16.mxu0 %v1307_v0  ;;  %v1189_v52 = vpop.eup %1188 }
 0x36c   :  { %v224_v54 = vmul.f32 %v1189_v52, %v1173_v17 }
 0x36f   :  { %v1191_v53 = vpop.eup %1190 }
 0x370   :  { %v225_v55 = vmul.f32 %v1191_v53, %v1175_v19 }
 0x372   :  { %v226_v56 = vpack.c.bf16 %v225_v55, %v224_v54 }
 0x373   :  { %v1193_v62 = vpop.eup %1192 }
 0x374   :  { %1072 = vmatmul.mubr.msk.bf16.vlgmr.msra.gmra.mxu0 %vm203_vm4, %v226_v56  ;;  %v347_v1 = vmul.f32 %v1193_v62, %v1450_v21 }
 0x375   :  { %1082 = vmatpush3.bf16.msra.mxu0 %v351_v57  ;;  %1083 = vmatprep.mubr.msk.bf16.mxu0 %vm1308_vm0, %v1307_v0 }
 0x376   :  { %1093 = vmatprep.subr.bf16.mxu0 %v1307_v0 }
 0x396   :  { %v344_v13 = vpop.xlane.xlu1 %343 }
 0x397   :  { %1194 = vrcp.f32 %v344_v13 }
 0x39a   :  { %v476_v58 = vpop.xlane.xlu1 %475  ;;  %v473_v59 = vpop.xlane.xlu0 %472 }
 0x39b   :  { %1196 = vrcp.f32 %v476_v58 }
 0x39c   :  { %1198 = vrcp.f32 %v473_v59 }
 0x39e   :  { %v608_v60 = vpop.xlane.xlu1 %607  ;;  %v605_v61 = vpop.xlane.xlu0 %604 }
 0x39f   :  { %1200 = vrcp.f32 %v608_v60  ;;  %v1167_v60 = vld [vmem:[#allocation8] sm:$0xff]  }
 0x3a0   :  { %1202 = vrcp.f32 %v605_v61 }
 0x3a2   :  { %v483_v8 = vpop.permute.xlu1 %482  ;;  %v615_v15 = vpop.permute.xlu0 %614 }
 0x3a4   :  { %v1195_v63 = vpop.eup %1194 }
 0x3a5   :  { %v348_v2 = vmul.f32 %v1195_v63, %v1179_v38 }
 0x3a7   :  { %v349_v5 = vpack.c.bf16 %v348_v2, %v347_v1 }
 0x3a8   :  { %v1197_v6 = vpop.eup %1196 }
 0x3a9   :  { %v1199_v7 = vpop.eup %1198  ;;  %1084 = vmatmul.mubr.msk.bf16.vlgmr.msra.gmra.mxu0 %vm203_vm4, %v349_v5  ;;  %v480_v10 = vmul.f32 %v1197_v6, %v1183_v41 }
 0x3aa   :  { %1094 = vmatpush3.bf16.msra.mxu0 %v483_v8  ;;  %1095 = vmatprep.mubr.msk.bf16.mxu0 %vm1308_vm0, %v1307_v0  ;;  %v479_v9 = vmul.f32 %v1199_v7, %v1181_v39 }
 0x3ab   :  { %1105 = vmatprep.subr.bf16.mxu0 %v1307_v0 }
 0x3ac   :  { %v1201_v11 = vpop.eup %1200  ;;  %v481_v12 = vpack.c.bf16 %v480_v10, %v479_v9 }
 0x3ad   :  { %v1203_v14 = vpop.eup %1202  ;;  %v612_v17 = vmul.f32 %v1201_v11, %v1187_v45 }
 0x3ae   :  { %v611_v16 = vmul.f32 %v1203_v14, %v1458_v42  ;;  %v1507_v14 = vld [vmem:[%s1559_s5 + $0x4] ss:$0 sm:$0xff] }
 0x3b0   :  { %v613_v18 = vpack.c.bf16 %v612_v17, %v611_v16 }
 0x3b1   :  { %1096 = vmatmul.mubr.msk.bf16.vlgmr.msra.gmra.mxu0 %vm203_vm4, %v481_v12 }
 0x3b2   :  { %1106 = vmatpush3.bf16.msra.mxu0 %v615_v15  ;;  %1107 = vmatprep.mubr.msk.bf16.mxu0 %vm1308_vm0, %v1307_v0 }
 0x3b3   :  { %1119 = vmatprep.subr.bf16.mxu0 %v1307_v0 }
 0x3b9   :  { %1108 = vmatmul.mubr.msk.bf16.vlgmr.msra.gmra.mxu0 %vm203_vm4, %v613_v18 }
 0x3ba   :  { %1123 = vmatprep.mubr.msk.bf16.mxu0 %vm1308_vm0, %v1307_v0 }
 0x434   :  { %v267_v19 = vpop.f32.mrf.mxu0 }
 0x435   :  { %274 = vst.msk [vmem:[#allocation2] sm:$0xff] %vm155_vm2, %v267_v19 }
 0x436   :  { %v1073_v20 = vpop.f32.mrf.mxu0 }
 0x438   :  { %v270_v21 = vpop.f32.mrf.mxu0 }
 0x439   :  { %275 = vst.msk [vmem:[#allocation2 + $0x8] sm:$0xff] %vm155_vm2, %v270_v21 }
 0x43a   :  { %v1074_v22 = vpop.f32.mrf.mxu0 }
 0x43b   :  { %v1514_v22 = vld [vmem:[%s1559_s5 + $0x5] ss:$0 sm:$0xff] }
 0x469   :  { %v390_v23 = vpop.f32.mrf.mxu0 }
 0x46a   :  { %399 = vrot.lane.b32.xlu1 %v390_v23, %s1320_s8 }
 0x46b   :  { %v1085_v24 = vpop.f32.mrf.mxu0 }
 0x46d   :  { %v393_v25 = vpop.f32.mrf.mxu0 }
 0x46e   :  { %401 = vrot.lane.b32.xlu0 %v393_v25, %s1320_s8 }
 0x46f   :  { %v1086_v26 = vpop.f32.mrf.mxu0 }
 0x471   :  { %v522_v27 = vpop.f32.mrf.mxu0 }
 0x472   :  { %531 = vrot.lane.b32.xlu1 %v522_v27, %s1321_s9  ;;  %v1168_v27 = vld [vmem:[%s1558_s4 + $0x18] sm:$0xff]  }
 0x473   :  { %v1097_v29 = vpop.f32.mrf.mxu0 }
 0x474   :  { %v1170_v29 = vld [vmem:[%s1558_s4 + $0x8] sm:$0xff]  }
 0x475   :  { %v525_v31 = vpop.f32.mrf.mxu0 }
 0x476   :  { %533 = vrot.lane.b32.xlu0 %v525_v31, %s1321_s9  ;;  %v1015_v31 = vld [vmem:[%s1559_s5 + $0x2] ss:$0 sm:$0xff] }
 0x477   :  { %v1098_v32 = vpop.f32.mrf.mxu0 }
 0x479   :  { %v654_v33 = vpop.f32.mrf.mxu0 }
 0x47a   :  { %663 = vrot.lane.b32.xlu1 %v654_v33, %s1322_s10 }
 0x47b   :  { %v1109_v34 = vpop.f32.mrf.mxu0 }
 0x47d   :  { %v657_v35 = vpop.f32.mrf.mxu0 }
 0x47e   :  { %665 = vrot.lane.b32.xlu0 %v657_v35, %s1322_s10 }
 0x47f   :  { %v1110_v36 = vpop.f32.mrf.mxu0 }
 0x4dc   :  { %v400_v37 = vpop.permute.xlu1 %399 }
 0x4dd   :  { %406 = vst.msk [vmem:[#allocation2] sm:$0xff] %vm405_vm5, %v400_v37 }
 0x4e0   :  { %v402_v38 = vpop.permute.xlu0 %401 }
 0x4e1   :  { %407 = vst.msk [vmem:[#allocation2 + $0x8] sm:$0xff] %vm405_vm5, %v402_v38 }
 0x4e4   :  { %v532_v39 = vpop.permute.xlu1 %531 }
 0x4e5   :  { %538 = vst.msk [vmem:[#allocation2] sm:$0xff] %vm537_vm6, %v532_v39 }
 0x4e8   :  { %v534_v40 = vpop.permute.xlu0 %533 }
 0x4e9   :  { %539 = vst.msk [vmem:[#allocation2 + $0x8] sm:$0xff] %vm537_vm6, %v534_v40 }
 0x4ec   :  { %v664_v41 = vpop.permute.xlu1 %663 }
 0x4ed   :  { %670 = vst.msk [vmem:[#allocation2] sm:$0xff] %vm669_vm7, %v664_v41 }
 0x4f0   :  { %v666_v42 = vpop.permute.xlu0 %665 }
 0x4f1   :  { %671 = vst.msk [vmem:[#allocation2 + $0x8] sm:$0xff] %vm669_vm7, %v666_v42 }
 0x4f4   :  { %v672_v43 = vld [vmem:[#allocation2] sm:$0xff] }
 0x4f8   :  { %v673_v44 = vld [vmem:[#allocation2 + $0x8] sm:$0xff] }
 0x4f9   :  { %v674_v45 = vpack.c.bf16 %v673_v44, %v672_v43 }
 0x4fb   :  { %1116 = vmatmul.mubr.msk.bf16.vlgmr.msra.gmra.mxu1 %vm98_vm1, %v674_v45 }
 0x4fc   :  { %1135 = vmatprep.mubr.msk.bf16.mxu1 %vm1308_vm0, %v1307_v0  ;;  %1128 = vmatpush3.bf16.msra.mxu1 %v1168_v27 }
 0x4fd   :  { %1129 = vmatprep.subr.bf16.mxu1 %v1307_v0 }
 0x500   :  { %1130 = vmatpush3.bf16.msra.mxu1 %v1169_v28 }
 0x501   :  { %1131 = vmatprep.subr.bf16.mxu1 %v1307_v0 }
 0x504   :  { %1132 = vmatpush3.bf16.msra.mxu1 %v1170_v29 }
 0x505   :  { %1133 = vmatprep.subr.bf16.mxu1 %v1307_v0 }
 0x508   :  { %1134 = vmatpush3.bf16.msra.mxu1 %v1171_v30 }
 0x5bb   :  { %v732_v47 = vpop.f32.mrf.mxu1 }
 0x5bc   :  { %v733_v48 = vadd.f32 %v1009_v46, %v732_v47 }
 0x5bd   :  { %v1117_v49 = vpop.f32.mrf.mxu1 }
 0x5be   :  { %v739_v50 = vadd.f32 %v733_v48, %v1384_v3  ;;  %v1166_v3 = vld [vmem:[#allocation8 + $0x8] sm:$0xff]   ;;  %v1019_v48 = vld [vmem:[%s1559_s5 + $0x3] ss:$0 sm:$0xff]  ;;  %s1323_s5 = smov [#allocation9]  }
 0x5bf   :  { %v735_v51 = vpop.f32.mrf.mxu1  ;;  %1120 = vmatpush3.bf16.msra.mxu0 %v1166_v3  ;;  %s984_s24 = sshll.u32 %s1323_s5, 4  ;;  %s985_s24 = int_to_ptr.vmem [resolvable:$true] %s984_s24 }
 0x5c0   :  { %v736_v52 = vadd.f32 %v1009_v46, %v735_v51  ;;  %v741_v53 = vsel %vm98_vm1, %v739_v50, 0.0  ;;  %v750_v13 = vmul.f32 %v739_v50, %v739_v50  ;;  %1121 = vmatprep.subr.bf16.mxu0 %v1307_v0  ;;  %s1276_s25 = scalar_lea.vmem %s985_s24, 256  ;;  %p1281_p2 = scmp.lt.s32.totalorder %s985_s24, %s985_s24 }
 0x5c1   :  { %742 = vadd.xlane.f32.xlu1 %v741_v53  ;;  %v1118_v54 = vpop.f32.mrf.mxu1  ;;  %p1277_p1 = scmp.ne.s32.totalorder %s985_s24, %s1276_s25  ;;  %p1282_p3 = scmp.lt.s32.totalorder %s1276_s25, %s1276_s25 }
 0x5c2   :  { %v740_v55 = vadd.f32 %v736_v52, %v1389_v4  ;;  %v752_v59 = vsel %vm98_vm1, %v750_v13, 0.0 }
 0x5c3   :  { %1122 = vmatpush3.bf16.msra.mxu0 %v1167_v60  ;;  %p1283_p4 = por %p1282_p3, %p1281_p2 }
 0x5c4   :  { %v744_v56 = vsel %vm98_vm1, %v740_v55, 0.0  ;;  %v751_v57 = vmul.f32 %v740_v55, %v740_v55 }
 0x5c5   :  { %745 = vadd.xlane.f32.xlu0 %v744_v56  ;;  %p1284_p5 = pnand %p1283_p4, %p1277_p1 }
 0x5c6   :  { %v755_v58 = vsel %vm98_vm1, %v751_v57, 0.0 }
 0x5c7   :  { %756 = vadd.xlane.f32.xlu1 %v755_v58 }
 0x5c9   :  { %753 = vadd.xlane.f32.xlu0 %v752_v59 }
 0x64a   :  { %v743_v61 = vpop.xlane.xlu1 %742 }
 0x64b   :  { %v748_v4 = vmul.f32 0.03125, %v743_v61 }
 0x64d   :  { %v760_v7 = vmul.f32 %v748_v4, %v748_v4  ;;  %v768_v19 = vsub.f32 %v739_v50, %v748_v4 }
 0x64e   :  { %v746_v62 = vpop.xlane.xlu0 %745 }
 0x64f   :  { %v749_v63 = vmul.f32 0.03125, %v746_v62 }
 0x650   :  { %v757_v1 = vpop.xlane.xlu1 %756 }
 0x651   :  { %v761_v2 = vmul.f32 %v749_v63, %v749_v63  ;;  %v759_v5 = vmul.f32 0.03125, %v757_v1  ;;  %v769_v16 = vsub.f32 %v740_v55, %v749_v63 }
 0x652   :  { %v754_v6 = vpop.xlane.xlu0 %753 }
 0x653   :  { %v763_v8 = vsub.f32 %v759_v5, %v761_v2  ;;  %v758_v9 = vmul.f32 0.03125, %v754_v6 }
 0x655   :  { %v765_v10 = vadd.f32 1e-05, %v763_v8  ;;  %v762_v11 = vsub.f32 %v758_v9, %v760_v7 }
 0x657   :  { %1204 = vrsqrt.f32 %v765_v10  ;;  %v764_v12 = vadd.f32 1e-05, %v762_v11 }
 0x659   :  { %1206 = vrsqrt.f32 %v764_v12 }
 0x664   :  { %v1205_v15 = vpop.eup %1204 }
 0x665   :  { %v775_v17 = vmul.f32 %v1205_v15, %v1507_v14 }
 0x666   :  { %v1207_v18 = vpop.eup %1206 }
 0x667   :  { %v774_v20 = vmul.f32 %v1207_v18, %v1507_v14  ;;  %v777_v21 = vmul.f32 %v775_v17, %v769_v16 }
 0x669   :  { %v776_v23 = vmul.f32 %v774_v20, %v768_v19  ;;  %v783_v25 = vadd.f32 %v1514_v22, %v777_v21 }
 0x66b   :  { %v782_v24 = vadd.f32 %v1514_v22, %v776_v23 }
 0x66d   :  { %v784_v26 = vpack.c.bf16 %v783_v25, %v782_v24 }
 0x66f   :  { %1124 = vmatmul.mubr.msk.bf16.vlgmr.msra.gmra.mxu0 %vm98_vm1, %v784_v26 }
 0x72f   :  { %v842_v32 = vpop.f32.mrf.mxu0 }
 0x730   :  { %v843_v33 = vadd.f32 %v1015_v31, %v842_v32 }
 0x731   :  { %v1125_v34 = vpop.f32.mrf.mxu0 }
 0x732   :  { %v851_v35 = vmul.f32 0.70710677, %v843_v33  ;;  %v849_v42 = vmul.f32 0.5, %v843_v33 }
 0x733   :  { %v845_v36 = vpop.f32.mrf.mxu0 }
 0x734   :  { %1208 = verf.f32 %v851_v35  ;;  %v846_v37 = vadd.f32 %v1015_v31, %v845_v36 }
 0x735   :  { %v1126_v38 = vpop.f32.mrf.mxu0 }
 0x736   :  { %v852_v39 = vmul.f32 0.70710677, %v846_v37  ;;  %v850_v43 = vmul.f32 0.5, %v846_v37 }
 0x738   :  { %1210 = verf.f32 %v852_v39 }
 0x741   :  { %v1209_v0 = vpop.eup %1208 }
 0x742   :  { %v855_v40 = vadd.f32 1.0, %v1209_v0 }
 0x744   :  { %v857_v45 = vmul.f32 %v855_v40, %v849_v42 }
 0x745   :  { %v1211_v41 = vpop.eup %1210 }
 0x746   :  { %v856_v44 = vadd.f32 1.0, %v1211_v41 }
 0x748   :  { %v858_v46 = vmul.f32 %v856_v44, %v850_v43 }
 0x74a   :  { %v859_v47 = vpack.c.bf16 %v858_v46, %v857_v45 }
 0x74c   :  { %1136 = vmatmul.mubr.msk.bf16.vlgmr.msra.gmra.mxu1 %vm896_vm8, %v859_v47 }
 0x80c   :  { %v934_v49 = vpop.f32.mrf.mxu1 }
 0x80d   :  { %v935_v50 = vadd.f32 %v1019_v48, %v934_v49 }
 0x80e   :  { %v1137_v51 = vpop.f32.mrf.mxu1 }
 0x80f   :  { %v941_v52 = vadd.f32 %v935_v50, %v782_v24 }
 0x810   :  { %v937_v53 = vpop.f32.mrf.mxu1 }
 0x811   :  { %v938_v54 = vadd.f32 %v1019_v48, %v937_v53  ;;  %v943_v55 = vsel %vm98_vm1, %v941_v52, 0.0  ;;  %v951_v56 = vmul.f32 %v941_v52, %v941_v52 }
 0x812   :  { %944 = vadd.xlane.f32.xlu0 %v943_v55  ;;  %v1138_v57 = vpop.f32.mrf.mxu1 }
 0x813   :  { %v942_v13 = vadd.f32 %v938_v54, %v783_v25  ;;  %v953_v58 = vsel %vm98_vm1, %v951_v56, 0.0 }
 0x815   :  { %v946_v59 = vsel %vm98_vm1, %v942_v13, 0.0  ;;  %v952_v3 = vmul.f32 %v942_v13, %v942_v13 }
 0x816   :  { %954 = vadd.xlane.f32.xlu0 %v953_v58  ;;  %947 = vadd.xlane.f32.xlu1 %v946_v59 }
 0x817   :  { %v956_v60 = vsel %vm98_vm1, %v952_v3, 0.0 }
 0x81a   :  { %957 = vadd.xlane.f32.xlu1 %v956_v60 }
 0x89b   :  { %v945_v61 = vpop.xlane.xlu0 %944 }
 0x89c   :  { %v949_v62 = vmul.f32 0.03125, %v945_v61 }
 0x89e   :  { %v961_v1 = vmul.f32 %v949_v62, %v949_v62  ;;  %v969_v16 = vsub.f32 %v941_v52, %v949_v62 }
 0x89f   :  { %v955_v4 = vpop.xlane.xlu0 %954  ;;  %v948_v63 = vpop.xlane.xlu1 %947 }
 0x8a0   :  { %v959_v2 = vmul.f32 0.03125, %v955_v4  ;;  %v950_v5 = vmul.f32 0.03125, %v948_v63 }
 0x8a2   :  { %v963_v6 = vsub.f32 %v959_v2, %v961_v1  ;;  %v962_v9 = vmul.f32 %v950_v5, %v950_v5  ;;  %v970_v20 = vsub.f32 %v942_v13, %v950_v5 }
 0x8a3   :  { %v958_v7 = vpop.xlane.xlu1 %957 }
 0x8a4   :  { %v965_v8 = vadd.f32 1e-05, %v963_v6  ;;  %v960_v10 = vmul.f32 0.03125, %v958_v7 }
 0x8a6   :  { %1212 = vrsqrt.f32 %v965_v8  ;;  %v964_v11 = vsub.f32 %v960_v10, %v962_v9 }
 0x8a8   :  { %v966_v12 = vadd.f32 1e-05, %v964_v11 }
 0x8aa   :  { %1214 = vrsqrt.f32 %v966_v12 }
 0x8b3   :  { %v1213_v15 = vpop.eup %1212 }
 0x8b4   :  { %v971_v17 = vmul.f32 %v1213_v15, %v1507_v14 }
 0x8b6   :  { %v973_v18 = vmul.f32 %v971_v17, %v969_v16 }
 0x8b7   :  { %v1215_v19 = vpop.eup %1214 }
 0x8b8   :  { %v972_v21 = vmul.f32 %v1215_v19, %v1507_v14  ;;  %v975_v23 = vadd.f32 %v1514_v22, %v973_v18 }
 0x8ba   :  { %v974_v24 = vmul.f32 %v972_v21, %v970_v20  ;;  %977 = vst.msk [vmem:[#allocation9] sm:$0xff] %vm98_vm1, %v975_v23 }
 0x8bc   :  { %v976_v25 = vadd.f32 %v1514_v22, %v974_v24 }
 0x8be   :  { %978 = vst.msk [vmem:[#allocation9 + $0x8] sm:$0xff] %vm98_vm1, %v976_v25 }
 0x8bf   :  { %1287 = shalt.err (!%p1284_p5)
}
 0x8c0   :  { %s1324_s27 = smov 128  }
 0x8c1   :  { %990 = dma.vmem_to_hbm [thread:$0]  %s985_s24, 256, %s1560_s6, [#allocation5], %s1324_s27, %s1324_s27, %s1320_s8  }
 0x8c2   :  { %1300 = dma.done.wait [#allocation5], 256  }
 0x8c3   :  { %1301 = vsyncadd [#allocation5], 4294967040 }
 0x8c4   :  { %994 = vsyncpa [#allocation4], 1 }
 0x8c5   :  { %995 = vsyncpa [#allocation7], 1 }
 0x8c6   :  { %996 = vsyncpa [#allocation5], 1 }

</bundles_post_ra>
